<compile_context>
chip_gen: v6e
topology: v6e:2x2x1
jax: 0.10.0
libtpu: 0.0.40
codegen_flags: <defaults>
</compile_context>

<pallas_src>
import jax
import jax.numpy as jnp
from jax.experimental import pallas as pl
from jax.experimental.pallas import tpu as pltpu

_INV_SQRT2 = 0.7071067811865476


def _gelu_exact(x):
    # nn.GELU() default = exact erf-based GELU (computed in fp32).
    return 0.5 * x * (1.0 + jax.lax.erf(x * _INV_SQRT2))


def _round_up(x, m):
    return ((x + m - 1) // m) * m


def _mrl_head_kernel(bmap_ref, first_ref, x_ref, wp_ref, bp_ref, w1_ref, b1_ref,
                     w2_ref, b2_ref, w3_ref, b3_ref, wl_ref, out_ref, h_ref):
    """Grid = (row_tile i, out_tile j).

    Every out tile j belongs to exactly one nesting branch (branch_map[j]);
    the trunk weights for that branch are selected by the data-dependent
    index_maps.  The small MLP trunk is recomputed into the h scratch only
    when first_ref[j] == 1 (first out tile of a branch within this row tile)
    and reused for all remaining out tiles of that branch.
    """
    del bmap_ref  # only consumed by the index_maps
    j = pl.program_id(1)

    @pl.when(first_ref[j] == 1)
    def _():
        x = x_ref[...]                                                   # bf16
        # matryoshka projection (no activation)
        h = jnp.dot(x, wp_ref[...],
                    preferred_element_type=jnp.float32) + bp_ref[...]
        # 3-layer MLP, GELU after every linear (incl. the bottleneck one)
        h = _gelu_exact(jnp.dot(h.astype(jnp.bfloat16), w1_ref[...],
                                preferred_element_type=jnp.float32) + b1_ref[...])
        h = _gelu_exact(jnp.dot(h.astype(jnp.bfloat16), w2_ref[...],
                                preferred_element_type=jnp.float32) + b2_ref[...])
        h = _gelu_exact(jnp.dot(h.astype(jnp.bfloat16), w3_ref[...],
                                preferred_element_type=jnp.float32) + b3_ref[...])
        h_ref[...] = h.astype(jnp.bfloat16)

    # Last layer: weights already normalized in the wrapper -> plain matmul
    # over this branch's current out_dim tile.  Store in out_dtype (bf16 by
    # default) to halve the dominant HBM write traffic.
    out_ref[...] = jnp.dot(h_ref[...], wl_ref[...],
                           preferred_element_type=jnp.float32).astype(out_ref.dtype)


def mrl_dino_head_forward(x, branches, *, tile_n=512, tile_out=2048,
                          out_dtype=jnp.bfloat16, wl_buffers=2,
                          vmem_limit_bytes=None, return_padded=False):
    """Fused MRLDINOHead forward for all nesting branches in one pallas_call.

    x:        (N, in_dim) float32
    branches: list of dicts with keys wp, bp, w1, b1, w2, b2, w3, b3, wl,
              weights in (in_features, out_features) layout, biases (1, out),
              wl = raw (un-normalized) V^T of shape (bottleneck, out_i).
    Returns a tuple of (N, out_i) arrays (one per branch), or — if
    return_padded=True — (padded_out, offsets, out_dims) so the caller can
    fuse the per-branch slicing and avoid extra HBM copies.
    """
    n, in_dim = x.shape
    dmax = max(p["wp"].shape[1] for p in branches)
    hidden = branches[0]["w1"].shape[1]
    bneck = branches[0]["w3"].shape[1]
    out_dims = [p["wl"].shape[1] for p in branches]

    # ---- tile sizing: lane-dense (multiple of 128) out tiles, sublane (8)
    # aligned row tiles, both clamped to the actual problem size. ----
    tile_out = min(_round_up(tile_out, 128), _round_up(max(out_dims), 128))
    tile_n = max(8, min(_round_up(tile_n, 8), _round_up(n, 8)))
    n_pad = _round_up(n, tile_n)

    def pad_to(a, shape):
        return jnp.pad(a, [(0, s - d) for d, s in zip(a.shape, shape)])

    # ---- trunk weights: stacked per branch, zero-padded to the max nesting
    # dim (padding is mathematically inert: zero projection columns produce
    # h == 0 and the matching padded rows of W1 are zero). ----
    wp = jnp.stack([pad_to(p["wp"], (in_dim, dmax)) for p in branches]).astype(jnp.bfloat16)
    bp = jnp.stack([pad_to(p["bp"], (1, dmax)) for p in branches]).astype(jnp.float32)
    w1 = jnp.stack([pad_to(p["w1"], (dmax, hidden)) for p in branches]).astype(jnp.bfloat16)
    b1 = jnp.stack([p["b1"] for p in branches]).astype(jnp.float32)
    w2 = jnp.stack([p["w2"] for p in branches]).astype(jnp.bfloat16)
    b2 = jnp.stack([p["b2"] for p in branches]).astype(jnp.float32)
    w3 = jnp.stack([p["w3"] for p in branches]).astype(jnp.bfloat16)
    b3 = jnp.stack([p["b3"] for p in branches]).astype(jnp.float32)

    # ---- weight_norm with g == 1:  W = V / ||V||  (per output unit, i.e.
    # per column of V^T).  Hoisted here -> computed once, not per tile.
    # NOTE: like torch's weight_norm, an all-zero column gives inf/NaN. ----
    def norm_cols(v):
        v = v.astype(jnp.float32)
        return v * jax.lax.rsqrt(jnp.sum(v * v, axis=0, keepdims=True))

    # Ragged concatenation of all branches' last layers along the out axis;
    # each branch padded only up to a whole number of out tiles (no padding
    # to the max branch out_dim -> no wasted FLOPs / stores).
    out_pads = [_round_up(od, tile_out) for od in out_dims]
    offsets = []
    acc = 0
    for pdim in out_pads:
        offsets.append(acc)
        acc += pdim
    total_out = acc
    wl = jnp.concatenate(
        [pad_to(norm_cols(p["wl"]), (bneck, pdim))
         for p, pdim in zip(branches, out_pads)], axis=1).astype(jnp.bfloat16)

    # ---- scalar-prefetch maps: out-tile -> branch id, and "first tile of a
    # branch" flag that gates the trunk recompute. ----
    tiles_per_branch = [pdim // tile_out for pdim in out_pads]
    branch_map_list, first_flag_list = [], []
    for b, t in enumerate(tiles_per_branch):
        branch_map_list += [b] * t
        first_flag_list += [1] + [0] * (t - 1)
    branch_map = jnp.array(branch_map_list, jnp.int32)
    first_flag = jnp.array(first_flag_list, jnp.int32)
    n_out_tiles = total_out // tile_out

    xp = pad_to(x, (n_pad, in_dim)).astype(jnp.bfloat16)

    grid = (n_pad // tile_n, n_out_tiles)

    # ---- VMEM budget: actual per-step footprint + headroom (do NOT blanket
    # 64 MiB: that's the entire per-TC VMEM on v7x). ----
    if vmem_limit_bytes is None:
        b16, b32 = 2, 4
        out_bytes = jnp.dtype(out_dtype).itemsize
        footprint = (
            2 * tile_n * in_dim * b16                                    # x (double buffered)
            + 2 * ((in_dim * dmax + dmax * hidden + hidden * hidden
                    + hidden * bneck) * b16
                   + (dmax + 2 * hidden + bneck) * b32)                  # one branch's trunk
            + max(2, wl_buffers) * bneck * tile_out * b16                # wl tiles
            + 2 * tile_n * tile_out * out_bytes                          # out tiles
            + tile_n * bneck * b16                                       # h scratch
            + 3 * tile_n * max(dmax, hidden) * b32                       # trunk fp32 temporaries
        )
        vmem_limit_bytes = int(min(max(footprint + 8 * 2**20, 16 * 2**20),
                                   100 * 2**20))

    wl_spec_kwargs = {}
    if wl_buffers > 2:
        # Only worth it if a profile shows exposed wl DMA (bf16 output shifts
        # the balance toward wl reads); negligible VMEM cost.
        wl_spec_kwargs["pipeline_mode"] = pl.Buffered(wl_buffers)

    out = pl.pallas_call(
        _mrl_head_kernel,
        out_shape=jax.ShapeDtypeStruct((n_pad, total_out), out_dtype),
        grid_spec=pltpu.PrefetchScalarGridSpec(
            num_scalar_prefetch=2,
            grid=grid,
            in_specs=[
                # x: depends only on the row-tile axis -> loaded once per row
                # tile and reused across all branches / out tiles.
                pl.BlockSpec((tile_n, in_dim), lambda i, j, bm, ff: (i, 0)),
                # trunk weights: only the CURRENT branch resident (data-
                # dependent index via the prefetched branch map).
                pl.BlockSpec((None, in_dim, dmax), lambda i, j, bm, ff: (bm[j], 0, 0)),
                pl.BlockSpec((None, 1, dmax), lambda i, j, bm, ff: (bm[j], 0, 0)),
                pl.BlockSpec((None, dmax, hidden), lambda i, j, bm, ff: (bm[j], 0, 0)),
                pl.BlockSpec((None, 1, hidden), lambda i, j, bm, ff: (bm[j], 0, 0)),
                pl.BlockSpec((None, hidden, hidden), lambda i, j, bm, ff: (bm[j], 0, 0)),
                pl.BlockSpec((None, 1, hidden), lambda i, j, bm, ff: (bm[j], 0, 0)),
                pl.BlockSpec((None, hidden, bneck), lambda i, j, bm, ff: (bm[j], 0, 0)),
                pl.BlockSpec((None, 1, bneck), lambda i, j, bm, ff: (bm[j], 0, 0)),
                # big (concatenated) last-layer weight: tiled along out_dim,
                # never fully resident in VMEM.
                pl.BlockSpec((bneck, tile_out), lambda i, j, bm, ff: (0, j),
                             **wl_spec_kwargs),
            ],
            out_specs=pl.BlockSpec((tile_n, tile_out),
                                   lambda i, j, bm, ff: (i, j)),
            scratch_shapes=[pltpu.VMEM((tile_n, bneck), jnp.bfloat16)],
        ),
        compiler_params=pltpu.CompilerParams(
            # Row axis is independent -> megacore-shardable (evenly balanced
            # on v7x's 2 TCs); the out axis carries the h-scratch reuse and
            # trunk recompute -> "arbitrary".
            dimension_semantics=("parallel", "arbitrary"),
            vmem_limit_bytes=vmem_limit_bytes,
        ),
    )(branch_map, first_flag, xp, wp, bp, w1, b1, w2, b2, w3, b3, wl)

    if return_padded:
        return out, tuple(offsets), tuple(out_dims)
    # NOTE: these per-branch slices cost an extra HBM read+write of the output;
    # latency-sensitive callers should use return_padded=True and fuse the
    # slicing into the consumer.
    return tuple(out[:n, off:off + od] for off, od in zip(offsets, out_dims))


def init_mrl_dino_head_params(key, in_dim, out_dim, nlayers=3, hidden_dim=32,
                              bottleneck_dim=32, nesting_list=None):
    """Deterministic synthetic init mirroring MRLDINOHead.__init__ shapes.

    Weights stored transposed to (in_features, out_features); biases (1, out).
    wl is the raw weight_v (transposed to (bottleneck, out_i)); normalization
    (weight_norm, g = 1) happens in the wrapper.
    """
    assert nlayers == 3, "this synthetic script fuses the nlayers=3 path"
    if nesting_list is None:
        nesting_list = [hidden_dim // 2, hidden_dim]

    def linear(key, fan_in, fan_out):
        kw, _ = jax.random.split(key)
        w = 0.02 * jax.random.normal(kw, (fan_in, fan_out), jnp.float32)  # ~trunc_normal(std=0.02)
        b = jnp.zeros((1, fan_out), jnp.float32)
        return w, b

    branches = []
    max_dim = nesting_list[-1]
    keys = jax.random.split(key, len(nesting_list))
    for dim, bkey in zip(nesting_list, keys):
        out_i = int(out_dim * (dim / max_dim))
        k = jax.random.split(bkey, 5)
        wp, bp = linear(k[0], in_dim, dim)
        w1, b1 = linear(k[1], dim, hidden_dim)
        w2, b2 = linear(k[2], hidden_dim, hidden_dim)
        w3, b3 = linear(k[3], hidden_dim, bottleneck_dim)
        wl = 0.02 * jax.random.normal(k[4], (bottleneck_dim, out_i), jnp.float32)
        branches.append(dict(wp=wp, bp=bp, w1=w1, b1=b1, w2=w2, b2=b2,
                             w3=w3, b3=b3, wl=wl))
    return nesting_list, branches


def _reference_forward(x, branches):
    """Pure-JAX reference mirroring the kernel's bf16-input / fp32-accumulate
    mixed precision (so the comparison isolates kernel correctness)."""
    cast = lambda a: a.astype(jnp.bfloat16)
    outs = []
    xb = cast(x)
    for p in branches:
        h = jnp.dot(xb, cast(p["wp"]), preferred_element_type=jnp.float32) + p["bp"]
        h = _gelu_exact(jnp.dot(cast(h), cast(p["w1"]),
                                preferred_element_type=jnp.float32) + p["b1"])
        h = _gelu_exact(jnp.dot(cast(h), cast(p["w2"]),
                                preferred_element_type=jnp.float32) + p["b2"])
        h = _gelu_exact(jnp.dot(cast(h), cast(p["w3"]),
                                preferred_element_type=jnp.float32) + p["b3"])
        v = p["wl"].astype(jnp.float32)
        w = v * jax.lax.rsqrt(jnp.sum(v * v, axis=0, keepdims=True))
        outs.append(jnp.dot(cast(h), cast(w), preferred_element_type=jnp.float32))
    return tuple(outs)


if __name__ == "__main__":
    # Small shapes consistent with the module (scaled-down hidden/bottleneck).
    N, IN_DIM = 16, 32
    OUT_DIM, HIDDEN, BOTTLENECK = 64, 32, 32

    key = jax.random.PRNGKey(0)
    kx, kp = jax.random.split(key)
    x = jax.random.normal(kx, (N, IN_DIM), jnp.float32)

    nesting_list, branches = init_mrl_dino_head_params(
        kp, IN_DIM, OUT_DIM, nlayers=3,
        hidden_dim=HIDDEN, bottleneck_dim=BOTTLENECK)

    outs = mrl_dino_head_forward(x, branches)
    outs = jax.block_until_ready(outs)

    refs = _reference_forward(x, branches)
    for o, r, dim in zip(outs, refs, nesting_list):
        expected_out = int(OUT_DIM * (dim / nesting_list[-1]))
        assert o.shape == (N, expected_out), o.shape
        o32 = o.astype(jnp.float32)
        r32 = r.astype(jnp.bfloat16).astype(jnp.float32)   # match bf16 output
        err = float(jnp.max(jnp.abs(o32 - r32)))
        assert jnp.allclose(o32, r32, rtol=2e-2, atol=1e-5), err

    print("KERNEL_OK")
</pallas_src>

<mosaic_0001>
module attributes {stable_mosaic.version = 11 : i64} {
  func.func @_mrl_head_kernel(%arg0: i32, %arg1: i32, %arg2: memref<2xi32, #tpu.memory_space<smem>>, %arg3: memref<2xi32, #tpu.memory_space<smem>>, %arg4: memref<16x32xbf16, #tpu.memory_space<vmem>>, %arg5: memref<1x32x32xbf16, #tpu.memory_space<vmem>>, %arg6: memref<1x1x32xf32, #tpu.memory_space<vmem>>, %arg7: memref<1x32x32xbf16, #tpu.memory_space<vmem>>, %arg8: memref<1x1x32xf32, #tpu.memory_space<vmem>>, %arg9: memref<1x32x32xbf16, #tpu.memory_space<vmem>>, %arg10: memref<1x1x32xf32, #tpu.memory_space<vmem>>, %arg11: memref<1x32x32xbf16, #tpu.memory_space<vmem>>, %arg12: memref<1x1x32xf32, #tpu.memory_space<vmem>>, %arg13: memref<32x128xbf16, #tpu.memory_space<vmem>>, %arg14: memref<16x128xbf16, #tpu.memory_space<vmem>>, %arg15: memref<16x32xbf16, #tpu.memory_space<vmem>>) attributes {dimension_semantics = [#tpu.dimension_semantics<parallel>, #tpu.dimension_semantics<arbitrary>], iteration_bounds = array<i64: 1, 2>, scalar_prefetch = 2 : i64, scratch_operands = 1 : i64, tpu.core_type = #tpu.core_type<tc>, window_params = [{transform_indices = @transform_0, window_bounds = array<i64: 16, 32>}, {transform_indices = @transform_1, window_bounds = array<i64: 1, 32, 32>}, {transform_indices = @transform_2, window_bounds = array<i64: 1, 1, 32>}, {transform_indices = @transform_3, window_bounds = array<i64: 1, 32, 32>}, {transform_indices = @transform_4, window_bounds = array<i64: 1, 1, 32>}, {transform_indices = @transform_5, window_bounds = array<i64: 1, 32, 32>}, {transform_indices = @transform_6, window_bounds = array<i64: 1, 1, 32>}, {transform_indices = @transform_7, window_bounds = array<i64: 1, 32, 32>}, {transform_indices = @transform_8, window_bounds = array<i64: 1, 1, 32>}, {transform_indices = @transform_9, window_bounds = array<i64: 32, 128>}, {transform_indices = @transform_10, window_bounds = array<i64: 16, 128>}]} {
    %0 = arith.index_cast %arg1 : i32 to index
    %1 = memref.load %arg3[%0] : memref<2xi32, #tpu.memory_space<smem>>
    %c1_i32 = arith.constant 1 : i32
    %2 = arith.cmpi eq, %1, %c1_i32 : i32
    %3 = arith.extui %2 : i1 to i32
    %c0_i32 = arith.constant 0 : i32
    %4 = arith.cmpi ne, %3, %c0_i32 : i32
    scf.if %4 {
      %c0_5 = arith.constant 0 : index
      %c0_6 = arith.constant 0 : index
      %10 = vector.load %arg4[%c0_5, %c0_6] : memref<16x32xbf16, #tpu.memory_space<vmem>>, vector<16x32xbf16>
      %c0_7 = arith.constant 0 : index
      %c0_8 = arith.constant 0 : index
      %c0_9 = arith.constant 0 : index
      %11 = vector.load %arg5[%c0_7, %c0_8, %c0_9] : memref<1x32x32xbf16, #tpu.memory_space<vmem>>, vector<1x32x32xbf16>
      %12 = vector.shape_cast %11 : vector<1x32x32xbf16> to vector<32x32xbf16>
      %cst_10 = arith.constant dense<0.000000e+00> : vector<16x32xf32>
      %13 = tpu.matmul %10, %12, %cst_10 {dimension_numbers = #tpu.dot_dimension_numbers<[1], [0], [0], [1], [0, 0, 1, 1], [], []>} : vector<16x32xbf16>, vector<32x32xbf16>, vector<16x32xf32> -> vector<16x32xf32>
      %c0_11 = arith.constant 0 : index
      %c0_12 = arith.constant 0 : index
      %c0_13 = arith.constant 0 : index
      %14 = vector.load %arg6[%c0_11, %c0_12, %c0_13] : memref<1x1x32xf32, #tpu.memory_space<vmem>>, vector<1x1x32xf32>
      %15 = vector.shape_cast %14 : vector<1x1x32xf32> to vector<1x32xf32>
      %16 = vector.broadcast %15 : vector<1x32xf32> to vector<16x32xf32>
      %17 = arith.addf %13, %16 : vector<16x32xf32>
      %18 = arith.truncf %17 : vector<16x32xf32> to vector<16x32xbf16>
      %c0_14 = arith.constant 0 : index
      %c0_15 = arith.constant 0 : index
      %c0_16 = arith.constant 0 : index
      %19 = vector.load %arg7[%c0_14, %c0_15, %c0_16] : memref<1x32x32xbf16, #tpu.memory_space<vmem>>, vector<1x32x32xbf16>
      %20 = vector.shape_cast %19 : vector<1x32x32xbf16> to vector<32x32xbf16>
      %cst_17 = arith.constant dense<0.000000e+00> : vector<16x32xf32>
      %21 = tpu.matmul %18, %20, %cst_17 {dimension_numbers = #tpu.dot_dimension_numbers<[1], [0], [0], [1], [0, 0, 1, 1], [], []>} : vector<16x32xbf16>, vector<32x32xbf16>, vector<16x32xf32> -> vector<16x32xf32>
      %c0_18 = arith.constant 0 : index
      %c0_19 = arith.constant 0 : index
      %c0_20 = arith.constant 0 : index
      %22 = vector.load %arg8[%c0_18, %c0_19, %c0_20] : memref<1x1x32xf32, #tpu.memory_space<vmem>>, vector<1x1x32xf32>
      %23 = vector.shape_cast %22 : vector<1x1x32xf32> to vector<1x32xf32>
      %24 = vector.broadcast %23 : vector<1x32xf32> to vector<16x32xf32>
      %25 = arith.addf %21, %24 : vector<16x32xf32>
      %cst_21 = arith.constant 5.000000e-01 : f32
      %26 = vector.broadcast %cst_21 : f32 to vector<16x32xf32>
      %27 = arith.mulf %26, %25 : vector<16x32xf32>
      %cst_22 = arith.constant 0.707106769 : f32
      %28 = vector.broadcast %cst_22 : f32 to vector<16x32xf32>
      %29 = arith.mulf %25, %28 : vector<16x32xf32>
      %30 = math.erf %29 : vector<16x32xf32>
      %cst_23 = arith.constant 1.000000e+00 : f32
      %31 = vector.broadcast %cst_23 : f32 to vector<16x32xf32>
      %32 = arith.addf %31, %30 : vector<16x32xf32>
      %33 = arith.mulf %27, %32 : vector<16x32xf32>
      %34 = arith.truncf %33 : vector<16x32xf32> to vector<16x32xbf16>
      %c0_24 = arith.constant 0 : index
      %c0_25 = arith.constant 0 : index
      %c0_26 = arith.constant 0 : index
      %35 = vector.load %arg9[%c0_24, %c0_25, %c0_26] : memref<1x32x32xbf16, #tpu.memory_space<vmem>>, vector<1x32x32xbf16>
      %36 = vector.shape_cast %35 : vector<1x32x32xbf16> to vector<32x32xbf16>
      %cst_27 = arith.constant dense<0.000000e+00> : vector<16x32xf32>
      %37 = tpu.matmul %34, %36, %cst_27 {dimension_numbers = #tpu.dot_dimension_numbers<[1], [0], [0], [1], [0, 0, 1, 1], [], []>} : vector<16x32xbf16>, vector<32x32xbf16>, vector<16x32xf32> -> vector<16x32xf32>
      %c0_28 = arith.constant 0 : index
      %c0_29 = arith.constant 0 : index
      %c0_30 = arith.constant 0 : index
      %38 = vector.load %arg10[%c0_28, %c0_29, %c0_30] : memref<1x1x32xf32, #tpu.memory_space<vmem>>, vector<1x1x32xf32>
      %39 = vector.shape_cast %38 : vector<1x1x32xf32> to vector<1x32xf32>
      %40 = vector.broadcast %39 : vector<1x32xf32> to vector<16x32xf32>
      %41 = arith.addf %37, %40 : vector<16x32xf32>
      %cst_31 = arith.constant 5.000000e-01 : f32
      %42 = vector.broadcast %cst_31 : f32 to vector<16x32xf32>
      %43 = arith.mulf %42, %41 : vector<16x32xf32>
      %cst_32 = arith.constant 0.707106769 : f32
      %44 = vector.broadcast %cst_32 : f32 to vector<16x32xf32>
      %45 = arith.mulf %41, %44 : vector<16x32xf32>
      %46 = math.erf %45 : vector<16x32xf32>
      %cst_33 = arith.constant 1.000000e+00 : f32
      %47 = vector.broadcast %cst_33 : f32 to vector<16x32xf32>
      %48 = arith.addf %47, %46 : vector<16x32xf32>
      %49 = arith.mulf %43, %48 : vector<16x32xf32>
      %50 = arith.truncf %49 : vector<16x32xf32> to vector<16x32xbf16>
      %c0_34 = arith.constant 0 : index
      %c0_35 = arith.constant 0 : index
      %c0_36 = arith.constant 0 : index
      %51 = vector.load %arg11[%c0_34, %c0_35, %c0_36] : memref<1x32x32xbf16, #tpu.memory_space<vmem>>, vector<1x32x32xbf16>
      %52 = vector.shape_cast %51 : vector<1x32x32xbf16> to vector<32x32xbf16>
      %cst_37 = arith.constant dense<0.000000e+00> : vector<16x32xf32>
      %53 = tpu.matmul %50, %52, %cst_37 {dimension_numbers = #tpu.dot_dimension_numbers<[1], [0], [0], [1], [0, 0, 1, 1], [], []>} : vector<16x32xbf16>, vector<32x32xbf16>, vector<16x32xf32> -> vector<16x32xf32>
      %c0_38 = arith.constant 0 : index
      %c0_39 = arith.constant 0 : index
      %c0_40 = arith.constant 0 : index
      %54 = vector.load %arg12[%c0_38, %c0_39, %c0_40] : memref<1x1x32xf32, #tpu.memory_space<vmem>>, vector<1x1x32xf32>
      %55 = vector.shape_cast %54 : vector<1x1x32xf32> to vector<1x32xf32>
      %56 = vector.broadcast %55 : vector<1x32xf32> to vector<16x32xf32>
      %57 = arith.addf %53, %56 : vector<16x32xf32>
      %cst_41 = arith.constant 5.000000e-01 : f32
      %58 = vector.broadcast %cst_41 : f32 to vector<16x32xf32>
      %59 = arith.mulf %58, %57 : vector<16x32xf32>
      %cst_42 = arith.constant 0.707106769 : f32
      %60 = vector.broadcast %cst_42 : f32 to vector<16x32xf32>
      %61 = arith.mulf %57, %60 : vector<16x32xf32>
      %62 = math.erf %61 : vector<16x32xf32>
      %cst_43 = arith.constant 1.000000e+00 : f32
      %63 = vector.broadcast %cst_43 : f32 to vector<16x32xf32>
      %64 = arith.addf %63, %62 : vector<16x32xf32>
      %65 = arith.mulf %59, %64 : vector<16x32xf32>
      %66 = arith.truncf %65 : vector<16x32xf32> to vector<16x32xbf16>
      %c0_44 = arith.constant 0 : index
      %c0_45 = arith.constant 0 : index
      %67 = vector.load %arg15[%c0_44, %c0_45] : memref<16x32xbf16, #tpu.memory_space<vmem>>, vector<16x32xbf16>
      tpu.vector_store %arg15[%c0_44, %c0_45], %66 {strides = array<i32>} : memref<16x32xbf16, #tpu.memory_space<vmem>>, vector<16x32xbf16>,
    } else {
    }
    %c0 = arith.constant 0 : index
    %c0_0 = arith.constant 0 : index
    %5 = vector.load %arg15[%c0, %c0_0] : memref<16x32xbf16, #tpu.memory_space<vmem>>, vector<16x32xbf16>
    %c0_1 = arith.constant 0 : index
    %c0_2 = arith.constant 0 : index
    %6 = vector.load %arg13[%c0_1, %c0_2] : memref<32x128xbf16, #tpu.memory_space<vmem>>, vector<32x128xbf16>
    %cst = arith.constant dense<0.000000e+00> : vector<16x128xf32>
    %7 = tpu.matmul %5, %6, %cst {dimension_numbers = #tpu.dot_dimension_numbers<[1], [0], [0], [1], [0, 0, 1, 1], [], []>} : vector<16x32xbf16>, vector<32x128xbf16>, vector<16x128xf32> -> vector<16x128xf32>
    %8 = arith.truncf %7 : vector<16x128xf32> to vector<16x128xbf16>
    %c0_3 = arith.constant 0 : index
    %c0_4 = arith.constant 0 : index
    %9 = vector.load %arg14[%c0_3, %c0_4] : memref<16x128xbf16, #tpu.memory_space<vmem>>, vector<16x128xbf16>
    tpu.vector_store %arg14[%c0_3, %c0_4], %8 {strides = array<i32>} : memref<16x128xbf16, #tpu.memory_space<vmem>>, vector<16x128xbf16>,
    return
  }
  func.func @transform_0(%arg0: i32, %arg1: i32, %arg2: memref<2xi32, #tpu.memory_space<smem>>, %arg3: memref<2xi32, #tpu.memory_space<smem>>) -> (i32, i32) {
    %c0_i32 = arith.constant 0 : i32
    %c0_i32_0 = arith.constant 0 : i32
    return %arg0, %c0_i32 : i32, i32
  }
  func.func @transform_1(%arg0: i32, %arg1: i32, %arg2: memref<2xi32, #tpu.memory_space<smem>>, %arg3: memref<2xi32, #tpu.memory_space<smem>>) -> (i32, i32, i32) {
    %0 = arith.index_cast %arg1 : i32 to index
    %1 = memref.load %arg2[%0] : memref<2xi32, #tpu.memory_space<smem>>
    %c0_i32 = arith.constant 0 : i32
    %c0_i32_0 = arith.constant 0 : i32
    %c0_i32_1 = arith.constant 0 : i32
    return %1, %c0_i32, %c0_i32_0 : i32, i32, i32
  }
  func.func @transform_2(%arg0: i32, %arg1: i32, %arg2: memref<2xi32, #tpu.memory_space<smem>>, %arg3: memref<2xi32, #tpu.memory_space<smem>>) -> (i32, i32, i32) {
    %0 = arith.index_cast %arg1 : i32 to index
    %1 = memref.load %arg2[%0] : memref<2xi32, #tpu.memory_space<smem>>
    %c0_i32 = arith.constant 0 : i32
    %c0_i32_0 = arith.constant 0 : i32
    %c0_i32_1 = arith.constant 0 : i32
    return %1, %c0_i32, %c0_i32_0 : i32, i32, i32
  }
  func.func @transform_3(%arg0: i32, %arg1: i32, %arg2: memref<2xi32, #tpu.memory_space<smem>>, %arg3: memref<2xi32, #tpu.memory_space<smem>>) -> (i32, i32, i32) {
    %0 = arith.index_cast %arg1 : i32 to index
    %1 = memref.load %arg2[%0] : memref<2xi32, #tpu.memory_space<smem>>
    %c0_i32 = arith.constant 0 : i32
    %c0_i32_0 = arith.constant 0 : i32
    %c0_i32_1 = arith.constant 0 : i32
    return %1, %c0_i32, %c0_i32_0 : i32, i32, i32
  }
  func.func @transform_4(%arg0: i32, %arg1: i32, %arg2: memref<2xi32, #tpu.memory_space<smem>>, %arg3: memref<2xi32, #tpu.memory_space<smem>>) -> (i32, i32, i32) {
    %0 = arith.index_cast %arg1 : i32 to index
    %1 = memref.load %arg2[%0] : memref<2xi32, #tpu.memory_space<smem>>
    %c0_i32 = arith.constant 0 : i32
    %c0_i32_0 = arith.constant 0 : i32
    %c0_i32_1 = arith.constant 0 : i32
    return %1, %c0_i32, %c0_i32_0 : i32, i32, i32
  }
  func.func @transform_5(%arg0: i32, %arg1: i32, %arg2: memref<2xi32, #tpu.memory_space<smem>>, %arg3: memref<2xi32, #tpu.memory_space<smem>>) -> (i32, i32, i32) {
    %0 = arith.index_cast %arg1 : i32 to index
    %1 = memref.load %arg2[%0] : memref<2xi32, #tpu.memory_space<smem>>
    %c0_i32 = arith.constant 0 : i32
    %c0_i32_0 = arith.constant 0 : i32
    %c0_i32_1 = arith.constant 0 : i32
    return %1, %c0_i32, %c0_i32_0 : i32, i32, i32
  }
  func.func @transform_6(%arg0: i32, %arg1: i32, %arg2: memref<2xi32, #tpu.memory_space<smem>>, %arg3: memref<2xi32, #tpu.memory_space<smem>>) -> (i32, i32, i32) {
    %0 = arith.index_cast %arg1 : i32 to index
    %1 = memref.load %arg2[%0] : memref<2xi32, #tpu.memory_space<smem>>
    %c0_i32 = arith.constant 0 : i32
    %c0_i32_0 = arith.constant 0 : i32
    %c0_i32_1 = arith.constant 0 : i32
    return %1, %c0_i32, %c0_i32_0 : i32, i32, i32
  }
  func.func @transform_7(%arg0: i32, %arg1: i32, %arg2: memref<2xi32, #tpu.memory_space<smem>>, %arg3: memref<2xi32, #tpu.memory_space<smem>>) -> (i32, i32, i32) {
    %0 = arith.index_cast %arg1 : i32 to index
    %1 = memref.load %arg2[%0] : memref<2xi32, #tpu.memory_space<smem>>
    %c0_i32 = arith.constant 0 : i32
    %c0_i32_0 = arith.constant 0 : i32
    %c0_i32_1 = arith.constant 0 : i32
    return %1, %c0_i32, %c0_i32_0 : i32, i32, i32
  }
  func.func @transform_8(%arg0: i32, %arg1: i32, %arg2: memref<2xi32, #tpu.memory_space<smem>>, %arg3: memref<2xi32, #tpu.memory_space<smem>>) -> (i32, i32, i32) {
    %0 = arith.index_cast %arg1 : i32 to index
    %1 = memref.load %arg2[%0] : memref<2xi32, #tpu.memory_space<smem>>
    %c0_i32 = arith.constant 0 : i32
    %c0_i32_0 = arith.constant 0 : i32
    %c0_i32_1 = arith.constant 0 : i32
    return %1, %c0_i32, %c0_i32_0 : i32, i32, i32
  }
  func.func @transform_9(%arg0: i32, %arg1: i32, %arg2: memref<2xi32, #tpu.memory_space<smem>>, %arg3: memref<2xi32, #tpu.memory_space<smem>>) -> (i32, i32) {
    %c0_i32 = arith.constant 0 : i32
    %c0_i32_0 = arith.constant 0 : i32
    return %c0_i32, %arg1 : i32, i32
  }
  func.func @transform_10(%arg0: i32, %arg1: i32, %arg2: memref<2xi32, #tpu.memory_space<smem>>, %arg3: memref<2xi32, #tpu.memory_space<smem>>) -> (i32, i32) {
    %c0_i32 = arith.constant 0 : i32
    return %arg0, %arg1 : i32, i32
  }
}

</mosaic_0001>

<bundles_post_ra>
// kernel: tpu_custom_call.1
= control target key start
LH: loop header
LB: loop body
LE: loop exit
PB: predicated region body
PF: predicated region fallthrough
CT: control target
= control target key end

     0   :  { %s2071_s21 = smov [#allocation4]   ;;  %s2889_s0 = inlined_call_operand.hbm [shape: s32[2], index: 0, kind: input, shape index: {}]   ;;  %s2890_s2 = inlined_call_operand.hbm [shape: bf16[16,32], index: 2, kind: input, shape index: {}]   ;;  %s2891_s3 = inlined_call_operand.hbm [shape: bf16[2,32,32], index: 3, kind: input, shape index: {}]   ;;  %s2892_s4 = inlined_call_operand.vmem [shape: f32[2,1,32], index: 4, kind: input, shape index: {}]   ;;  %s2893_s5 = inlined_call_operand.hbm [shape: bf16[2,32,32], index: 5, kind: input, shape index: {}]   ;;  %s2894_s6 = inlined_call_operand.vmem [shape: f32[2,1,32], index: 6, kind: input, shape index: {}]   ;;  %s2895_s7 = inlined_call_operand.hbm [shape: bf16[2,32,32], index: 7, kind: input, shape index: {}]   ;;  %s2896_s8 = inlined_call_operand.vmem [shape: f32[2,1,32], index: 8, kind: input, shape index: {}]   ;;  %s2897_s9 = inlined_call_operand.hbm [shape: bf16[2,32,32], index: 9, kind: input, shape index: {}]   ;;  %s2898_s10 = inlined_call_operand.vmem [shape: f32[2,1,32], index: 10, kind: input, shape index: {}]   ;;  %s2899_s11 = inlined_call_operand.hbm [shape: bf16[32,256], index: 11, kind: input, shape index: {}]   ;;  %s2900_s12 = inlined_call_operand.hbm [shape: bf16[16,256], index: 12, kind: output, shape index: {}]   ;;  %s2901_s1 = inlined_call_operand.vmem [shape: s32[2], index: 1, kind: input, shape index: {}]  }
   0x1   :  { %2937 = sst [smem:[#allocation52_spill]] %s2890_s2  ;;  %s19_s26 = sshll.u32 %s2901_s1, 4  ;;  %s20_s26 = int_to_ptr.vmem [resolvable:$true] %s19_s26 }
   0x2   :  { %2938 = sst [smem:[#allocation53_spill]] %s2891_s3  ;;  %s1693_s27 = scalar_lea.vmem %s20_s26, 16 }
   0x3   :  { %2939 = sst [smem:[#allocation54_spill]] %s2892_s4  ;;  %p1694_p0 = scmp.ne.s32.totalorder %s20_s26, %s1693_s27 }
   0x4   :  { %2940 = sst [smem:[#allocation55_spill]] %s2893_s5  ;;  %p1698_p1 = scmp.lt.s32.totalorder %s20_s26, %s20_s26 }
   0x5   :  { %2941 = sst [smem:[#allocation56_spill]] %s2894_s6  ;;  %p1699_p2 = scmp.lt.s32.totalorder %s1693_s27, %s1693_s27 }
   0x6   :  { %2942 = sst [smem:[#allocation57_spill]] %s2895_s7 }
   0x7   :  { %2943 = sst [smem:[#allocation58_spill]] %s2896_s8  ;;  %p1700_p3 = por %p1699_p2, %p1698_p1 }
   0x8   :  { %2944 = sst [smem:[#allocation59_spill]] %s2897_s9 }
   0x9   :  { %2945 = sst [smem:[#allocation60_spill]] %s2898_s10  ;;  %p1701_p4 = pnand %p1700_p3, %p1694_p0 }
   0xa   :  { %2946 = sst [smem:[#allocation61_spill]] %s2899_s11 }
   0xb   :  { %2947 = sst [smem:[#allocation62_spill]] %s2900_s12 }
   0xc   :  { %18 = dma.hbm_to_smem %s2889_s0, 16, %s2071_s21, [#allocation3] }
   0xd   :  { %1704 = shalt.err (!%p1701_p4)  }
   0xe   :  { %s2072_s28 = smov [#allocation5]  }
   0xf   :  { %22 = dma.vmem_to_smem %s20_s26, 16, %s2072_s28, [#allocation3] }
  0x10   :  { %1969 = dma.done.wait [#allocation3], 32 }
  0x11   :  { %1970 = vsyncadd [#allocation3], 4294967264 }
  0x12   :  { %24 = sfence }
  0x13   :  { %25 = vsyncpa [#allocation7], 0 }
  0x14   :  { %26 = vsyncpa [#allocation10], 0 }
  0x15   :  { %28 = vsyncpa [#allocation10 + $0x1], 0 }
  0x16   :  { %29 = vsyncpa [#allocation13], 0 }
  0x17   :  { %31 = vsyncpa [#allocation13 + $0x1], 0 }
  0x18   :  { %32 = vsyncpa [#allocation16], 0 }
  0x19   :  { %34 = vsyncpa [#allocation16 + $0x1], 0 }
  0x1a   :  { %35 = vsyncpa [#allocation8], 0 }
  0x1b   :  { %37 = vsyncpa [#allocation8 + $0x1], 0  ;;  %s2161_s0 = smov 0   ;;  %s2163_s1 = smov 0  }
  0x1c   :  { %s2165_s29 = smov 0   ;;  %s2167_s30 = smov 0  }
  0x1d   :  { %s2169_s13 = smov 0   ;;  %s2171_s14 = smov 0  }
  0x1e   :  { %s2173_s15 = smov 0   ;;  %s2175_s16 = smov 0  }
  0x1f   :  { %s2177_s17 = smov 0   ;;  %s2179_s18 = smov 0  }
  0x20   :  { %s2181_s19 = smov 0   ;;  %s2183_s20 = smov 0  }
  0x21   :  { %s2185_s21 = smov 0   ;;  %s2187_s22 = smov 0  }
  0x22   :  { %s2189_s23 = smov 0   ;;  %s2191_s24 = smov 0  }
  0x23   :  { %s2193_s25 = smov 0   ;;  %s2195_s26 = smov 0  }
  0x24 LB: > { %2948 = sst [smem:[#allocation34_spill]] %s2001_s0  ;;  %s2250_s27 = sadd.s32 4294967295, %s2069_s26   ;;  %s2069_s26 = sphi %s2195_s26, %s43_s26   ;;  %s2065_s25 = sphi %s2193_s25, %s3080_s25   ;;  %s2061_s24 = sphi %s2191_s24, %s3089_s24   ;;  %s2057_s23 = sphi %s2189_s23, %s3078_s23   ;;  %s2053_s22 = sphi %s2187_s22, %s3077_s22   ;;  %s2049_s21 = sphi %s2185_s21, %s3088_s21   ;;  %s2045_s20 = sphi %s2183_s20, %s3075_s20   ;;  %s2041_s19 = sphi %s2181_s19, %s3074_s19   ;;  %s2037_s18 = sphi %s2179_s18, %s3073_s18   ;;  %s2033_s17 = sphi %s2177_s17, %s3072_s17   ;;  %s2029_s16 = sphi %s2175_s16, %s3087_s16   ;;  %s2025_s15 = sphi %s2173_s15, %s3086_s15   ;;  %s2021_s14 = sphi %s2171_s14, %s3085_s14   ;;  %s2017_s13 = sphi %s2169_s13, %s3084_s13   ;;  %s2013_s30 = sphi %s2167_s30, %s3083_s30   ;;  %s2009_s29 = sphi %s2165_s29, %s3081_s29   ;;  %s2005_s1 = sphi %s2163_s1, %s3068_s1   ;;  %s2001_s0 = sphi %s2161_s0, %s3067_s0  }
  0x25   : > { %2949 = sst [smem:[#allocation35_spill]] %s2005_s1  ;;  %s52_s28 = sadd.s32 1, %s2065_s25 }
  0x26   : > { %2950 = sst [smem:[#allocation36_spill]] %s2009_s29  ;;  %p53_p5 = scmp.ge.s32.totalorder %s52_s28, 2 }
  0x27   : > { %2951 = sst [smem:[#allocation37_spill]] %s2021_s14  ;;  %s90_s10 = sadd.s32 1, %s2057_s23 }
  0x28   : > { %2952 = sst [smem:[#allocation38_spill]] %s2033_s17  ;;  %p97_p6 = scmp.ne.s32.totalorder %s2057_s23, %s2053_s22 }
  0x29   : > { %2953 = sst [smem:[#allocation39_spill]] %s2041_s19  ;;  %s3091_s28 = smov (%p53_p5, %s52_s28), 0 }
  0x2a   : > { %2954 = sst [smem:[#allocation40_spill]] %s2045_s20  ;;  %p2915_p7 = scmp.eq.s32.totalorder %s2069_s26, 0 }
  0x2b   : > { %2955 = sst [smem:[#allocation41_spill]] %s2053_s22  ;;  %p103_p8 = scmp.ne.s32.totalorder %s2053_s22, %s2049_s21 }
  0x2c   : > { %2956 = sst [smem:[#allocation42_spill]] %s2057_s23  ;;  %p2913_p9 = scmp.eq.s32.totalorder %s2250_s27, 0 }
  0x2d   : > { %2957 = sst [smem:[#allocation43_spill]] %s2061_s24  ;;  %p2265_p10 = por %p2915_p7, %p97_p6 }
  0x2e   : > { %2958 = sst [smem:[#allocation44_spill]] %s2065_s25  ;;  %p2271_p11 = por %p2913_p9, %p103_p8 }
  0x2f   : > { %s85_s12 = sld [smem:[#allocation4 + %s2065_s25]]  ;;  %p2912_p13 = scmp.lt.s32.totalorder %s2069_s26, 2 }
  0x30   : > { %2959 = sst [smem:[#allocation45_spill]] %s3091_s28  ;;  %s395_s24 = sand.u32 1, %s2057_s23  }
  0x31   : > { %s86_s8 = sld [smem:[#allocation4 + %s3091_s28]]  ;;  %s1324_s11 = sshll.u32 %s395_s24, 4 }
  0x32   : > { %s2961_s4 = scalar_select %p2271_p11, 1, 0 }
  0x33   : > { %s1446_s9 = scalar_select %p2265_p10, [#allocation4], [#allocation18] }
  0x34   : > { %2962 = sst [smem:[#allocation46_spill]] %s2961_s4  ;;  %s397_s21 = scalar_lea.vmem [#allocation9], %s1324_s11 }
  0x35   : > { %s1447_s4 = scalar_select %p2265_p10, %s2065_s25, 0 }
  0x36   : > { %s3093_s9 = smov (!%p2912_p13, %s1446_s9), [#allocation22]  ;;  %s405_s1 = sshll.u32 %s397_s21, 4  ;;  %s2299_s1 = int_to_ptr.vmem [resolvable:$true] %s405_s1 }
  0x37   : > { %s87_s22 = ssub.s32 %s85_s12, %s86_s8  ;;  %s3095_s4 = smov (!%p2912_p13, %s1447_s4), 0 }
  0x38   : > { %p88_p0 = scmp.eq.s32.totalorder %s87_s22, 0  ;;  %p2295_p1 = pnand %p2912_p13, %p2265_p10 }
  0x39   : > { %s398_s12 = sld [smem:[%s3093_s9 + %s3095_s4]]  ;;  %s2966_s21 = sand.u32 1, %s2069_s26  }
  0x3a   : > { %s2282_s0 = scalar_select %p88_p0, %s2057_s23, %s90_s10  }
  0x3b   : > { %s2302_s10 = sld [smem:[#allocation4 + %s2065_s25]]  ;;  %s2319_s4 = scalar_lea.sflag [#allocation10], %s2966_s21 }
  0x3c   : > { %2963 = sst [smem:[#allocation47_spill]] %s2282_s0  ;;  %p1707_p5 = pneg %p2295_p1 }
  0x3d   : > { %s2305_s22 = sld [smem:[#allocation4 + %s3091_s28]] }
  0x3e   : > { %s2965_s3 = sld [smem:[#allocation53_spill]] }
  0x3f   : > { %s1376_s0 = sshll.u32 %s398_s12, 8 }
  0x44   : > { %s2313_s6 = scalar_lea.hbm %s2965_s3, %s1376_s0  ;;  %s1710_s29 = scalar_lea.hbm %s2965_s3, 512 }
  0x45   : > { %s1705_s9 = scalar_lea.hbm %s2313_s6, 256  ;;  %p1711_p10 = scmp.lt.s32.totalorder %s2313_s6, %s2965_s3 }
  0x46   : > { %p1706_p4 = scmp.ne.s32.totalorder %s2313_s6, %s1705_s9  ;;  %p1712_p0 = scmp.lt.s32.totalorder %s1710_s29, %s1705_s9 }
  0x48   : > { %p1708_p6 = pnand %p1707_p5, %p1706_p4  ;;  %p1713_p12 = por %p1712_p0, %p1711_p10 }
  0x4a   : > { %p1709_p8 = pneg %p1708_p6 }
  0x4c   : > { %p1714_p13 = pnand %p1713_p12, %p1709_p8 }
  0x4e   : > { %1717 = shalt.err (!%p1714_p13)
}
  0x4f   : > { %s1718_s11 = scalar_lea.vmem %s2299_s1, 256  ;;  %s2073_s21 = smov [#allocation9]  }
  0x50   : > { %p1719_p3 = scmp.ne.s32.totalorder %s2299_s1, %s1718_s11  ;;  %s1723_s5 = sshll.u32 %s2073_s21, 4  ;;  %s1724_s5 = int_to_ptr.vmem [resolvable:$false] %s1723_s5 }
  0x51   : > { %s1725_s24 = scalar_lea.vmem %s1724_s5, 512  ;;  %p1726_p6 = scmp.lt.s32.totalorder %s2299_s1, %s1724_s5 }
  0x52   : > { %p1721_p9 = pnand %p1719_p3, %p1707_p5  ;;  %p1727_p2 = scmp.lt.s32.totalorder %s1725_s24, %s1718_s11 }
  0x54   : > { %p1722_p4 = pneg %p1721_p9  ;;  %p1728_p7 = por %p1727_p2, %p1726_p6 }
  0x56   : > { %p1729_p11 = pnand %p1728_p7, %p1722_p4 }
  0x58   : > { %1732 = shalt.err (!%p1729_p11)
}
  0x59   : > { %s2917_s29 = smov 64   ;;  %s2919_s5 = smov 4  }
  0x5a   : > { %1477 = dma.hbm_to_vmem [thread:$0]  (!%p2295_p1), %s2313_s6, 256, %s2299_s1, %s2319_s4, %s2917_s29, %s2917_s29, %s2919_s5  }
  0x5b   : > { %p2967_p7 = scmp.eq.s32.totalorder %s2069_s26, 0  ;;  %p2968_p9 = scmp.ne.s32.totalorder %s2033_s17, %s2029_s16 }
  0x5c   : > { %p2970_p12 = scmp.eq.s32.totalorder %s2250_s27, 0  ;;  %p2971_p13 = scmp.ne.s32.totalorder %s2029_s16, %s2025_s15 }
  0x5d   : > { %p2348_p11 = por %p2968_p9, %p2967_p7  ;;  %s455_s8 = sand.u32 1, %s2033_s17  }
  0x5e   : > { %p2357_p2 = por %p2971_p13, %p2970_p12  ;;  %s199_s23 = ssub.s32 %s2302_s10, %s2305_s22 }
  0x5f   : > { %s1330_s1 = sshll.u32 %s455_s8, 4  ;;  %p200_p1 = scmp.eq.s32.totalorder %s199_s23, 0 }
  0x60   : > { %s2972_s12 = scalar_select %p2357_p2, 1, 0 }
  0x61   : > { %s1452_s6 = scalar_select %p2348_p11, [#allocation4], [#allocation20] }
  0x62   : > { %2973 = sst [smem:[#allocation48_spill]] %s2972_s12  ;;  %s2974_s0 = sadd.s32 1, %s2033_s17 }
  0x63   : > { %s2369_s11 = scalar_select %p200_p1, %s2033_s17, %s2974_s0  }
  0x64   : > { %s1453_s15 = scalar_select %p2348_p11, %s2065_s25, 0 }
  0x65   : > { %2975 = sst [smem:[#allocation49_spill]] %s2369_s11  ;;  %p2976_p3 = scmp.lt.s32.totalorder %s2069_s26, 2 }
  0x66   : > { %s457_s21 = scalar_lea.vmem [#allocation12], %s1330_s1  ;;  %p1321_p0 = scmp.ge.s32.totalorder %s2069_s26, 1 }
  0x67   : > { %s3097_s6 = smov (!%p2976_p3, %s1452_s6), [#allocation24]  ;;  %p2977_p5 = pmov %p2976_p3 }
  0x68   : > { %s465_s24 = sshll.u32 %s457_s21, 4  ;;  %p2978_p8 = pmov %p2976_p3  ;;  %s2386_s24 = int_to_ptr.vmem [resolvable:$true] %s465_s24 }
  0x69   : > { %s3099_s15 = smov (!%p2977_p5, %s1453_s15), 0  ;;  %p364_p4 = scmp.lt.s32.totalorder %s2069_s26, 3 }
  0x6a   : > { %p2382_p10 = pnand %p2978_p8, %p2348_p11  ;;  %s458_s22 = sld [smem:[%s3097_s6 + %s3099_s15]] }
  0x6b   : > { %s2076_s8 = smov [#allocation6]   ;;  %p2390_p6 = pnand %p1321_p0, %p364_p4 }
  0x6c   : > { %s379_s23 = sshll.u32 %s2076_s8, 4  ;;  %s2981_s7 = sld [smem:[#allocation57_spill]]  ;;  %s2394_s23 = int_to_ptr.vmem [resolvable:$true] %s379_s23 }
  0x6d   : > { %s2980_s0 = scalar_select %p2390_p6, 1, 0 }
  0x6e   : > { %s2982_s6 = sand.u32 1, %s2069_s26   ;;  %p1735_p11 = pneg %p2382_p10 }
  0x6f   : > { %s2405_s15 = scalar_lea.sflag [#allocation13], %s2982_s6 }
  0x70   : > { %s1378_s9 = sshll.u32 %s458_s22, 8 }
  0x72   : > { %s2399_s29 = scalar_lea.hbm %s2981_s7, %s1378_s9  ;;  %s1738_s1 = scalar_lea.hbm %s2981_s7, 512 }
  0x73   : > { %s1733_s8 = scalar_lea.hbm %s2399_s29, 256  ;;  %p1739_p1 = scmp.lt.s32.totalorder %s2399_s29, %s2981_s7 }
  0x74   : > { %p1734_p9 = scmp.ne.s32.totalorder %s2399_s29, %s1733_s8  ;;  %p1740_p3 = scmp.lt.s32.totalorder %s1738_s1, %s1733_s8 }
  0x76   : > { %p1736_p12 = pnand %p1735_p11, %p1734_p9  ;;  %p1741_p5 = por %p1740_p3, %p1739_p1 }
  0x78   : > { %p1737_p13 = pneg %p1736_p12 }
  0x7a   : > { %p1742_p8 = pnand %p1741_p5, %p1737_p13 }
  0x7c   : > { %1745 = shalt.err (!%p1742_p8)
}
  0x7d   : > { %s1746_s6 = scalar_lea.vmem %s2386_s24, 256  ;;  %s2077_s3 = smov [#allocation12]  }
  0x7e   : > { %p1747_p0 = scmp.ne.s32.totalorder %s2386_s24, %s1746_s6  ;;  %s1751_s11 = sshll.u32 %s2077_s3, 4  ;;  %s1752_s11 = int_to_ptr.vmem [resolvable:$false] %s1751_s11 }
  0x7f   : > { %s1753_s5 = scalar_lea.vmem %s1752_s11, 512  ;;  %p1754_p12 = scmp.lt.s32.totalorder %s2386_s24, %s1752_s11 }
  0x80   : > { %p1749_p4 = pnand %p1747_p0, %p1735_p11  ;;  %p1755_p7 = scmp.lt.s32.totalorder %s1753_s5, %s1746_s6 }
  0x82   : > { %p1750_p9 = pneg %p1749_p4  ;;  %p1756_p2 = por %p1755_p7, %p1754_p12 }
  0x84   : > { %p1757_p6 = pnand %p1756_p2, %p1750_p9 }
  0x86   : > { %1760 = shalt.err (!%p1757_p6)
}
  0x87   : > { %s2983_s8 = smov 4   ;;  %s2984_s22 = smov 64  }
  0x88   : > { %1487 = dma.hbm_to_vmem [thread:$0]  (!%p2382_p10), %s2399_s29, 256, %s2386_s24, %s2405_s15, %s2984_s22, %s2984_s22, %s2983_s8  }
  0x89   : > { %p2985_p11 = scmp.eq.s32.totalorder %s2250_s27, 0  ;;  %p2986_p13 = scmp.ne.s32.totalorder %s2980_s0, 0 }
  0x8a   : > { %s1772_s3 = scalar_lea.vmem %s2394_s23, 128  ;;  %p1780_p8 = scmp.lt.s32.totalorder %s2394_s23, %s2394_s23 }
  0x8b   : > { %p2987_p1 = pneg %p2986_p13  ;;  %p1773_p6 = scmp.ne.s32.totalorder %s2394_s23, %s1772_s3 }
  0x8c   : > { %p1781_p0 = scmp.lt.s32.totalorder %s1772_s3, %s1772_s3 }
  0x8d   : > { %p1469_p7 = pnand %p2987_p1, %p2985_p11 }
  0x8e   : > { %p1782_p4 = por %p1781_p0, %p1780_p8 }
  0x8f   : > { %p1763_p2 = pneg %p1469_p7 }
  0x91   : > { %p1775_p3 = pnand %p1773_p6, %p1763_p2 }
  0x93   : > { %p1776_p5 = pneg %p1775_p3 }
  0x95   : > { %p1783_p9 = pnand %p1782_p4, %p1776_p5 }
  0x97   : > { %1786 = shalt.err (!%p1783_p9)
}
  0x98   : > { %s2988_s2 = sld [smem:[#allocation52_spill]]  ;;  %s146_s10 = sadd.s32 1, %s2045_s20 }
  0x99   : > { %s141_s24 = sld [smem:[#allocation4 + %s2065_s25]]  ;;  %p153_p10 = scmp.ne.s32.totalorder %s2045_s20, %s2041_s19 }
  0x9a   : > { %s142_s1 = sld [smem:[#allocation4 + %s3091_s28]]  ;;  %p159_p12 = scmp.ne.s32.totalorder %s2041_s19, %s2037_s18 }
  0x9b   : > { %s425_s9 = sand.u32 1, %s2045_s20   ;;  %p2989_p11 = scmp.eq.s32.totalorder %s2069_s26, 0 }
  0x9c   : > { %p2993_p3 = scmp.lt.s32.totalorder %s2069_s26, 2  ;;  %p265_p4 = scmp.ne.s32.totalorder %s2021_s14, %s2017_s13 }
  0x9d   : > { %p2455_p1 = por %p153_p10, %p2989_p11  ;;  %p3000_p10 = pmov %p2989_p11 }
  0x9e   : > { %1471 = dma.hbm_to_vmem [thread:$0]  (!%p1469_p7), %s2988_s2, 128, %s2394_s23, [#allocation7], %s2984_s22, %s2984_s22, %s2983_s8  }
  0x9f   : > { %s1327_s23 = sshll.u32 %s425_s9, 4  ;;  %p2991_p7 = scmp.eq.s32.totalorder %s2250_s27, 0 }
  0xa0   : > { %s1449_s18 = scalar_select %p2455_p1, [#allocation4], [#allocation19] }
  0xa1   : > { %p2461_p2 = por %p159_p12, %p2991_p7  ;;  %s143_s3 = ssub.s32 %s141_s24, %s142_s1 }
  0xa2   : > { %s1450_s5 = scalar_select %p2455_p1, %s2065_s25, 0 }
  0xa3   : > { %s2992_s6 = scalar_select %p2461_p2, 1, 0 }
  0xa4   : > { %s427_s29 = scalar_lea.vmem [#allocation11], %s1327_s23  ;;  %p144_p6 = scmp.eq.s32.totalorder %s143_s3, 0 }
  0xa5   : > { %s435_s11 = sshll.u32 %s427_s29, 4  ;;  %s3101_s18 = smov (!%p2993_p3, %s1449_s18), [#allocation23]  ;;  %s2470_s11 = int_to_ptr.vmem [resolvable:$true] %s435_s11 }
  0xa6   : > { %s2475_s9 = scalar_select %p144_p6, %s2045_s20, %s146_s10  }
  0xa7   : > { %p2995_p5 = pmov %p2993_p3  ;;  %p2996_p8 = pmov %p2993_p3 }
  0xa8   : > { %2994 = sst [smem:[#allocation50_spill]] %s2475_s9  ;;  %p2506_p12 = por %p265_p4, %p3000_p10 }
  0xa9   : > { %s3103_s5 = smov (!%p2995_p5, %s1450_s5), 0  ;;  %p2483_p0 = pnand %p2996_p8, %p2455_p1 }
  0xaa   : > { %s428_s24 = sld [smem:[%s3101_s18 + %s3103_s5]] }
  0xab   : > { %s2488_s1 = sld [smem:[#allocation4 + %s2065_s25]]  ;;  %p1789_p1 = pneg %p2483_p0 }
  0xac   : > { %s2491_s23 = sld [smem:[#allocation4 + %s3091_s28]] }
  0xad   : > { %s2998_s20 = sld [smem:[#allocation55_spill]] }
  0xae   : > { %s3001_s18 = scalar_select %p2506_p12, 1, 0 }
  0xb0   : > { %s1377_s29 = sshll.u32 %s428_s24, 8 }
  0xb3   : > { %s2999_s12 = smov %s2998_s20  ;;  %s2502_s21 = scalar_lea.hbm %s2998_s20, %s1377_s29 }
  0xb4   : > { %s1787_s5 = scalar_lea.hbm %s2502_s21, 256  ;;  %s1792_s7 = scalar_lea.hbm %s2999_s12, 512 }
  0xb5   : > { %p1788_p11 = scmp.ne.s32.totalorder %s2502_s21, %s1787_s5  ;;  %p1793_p3 = scmp.lt.s32.totalorder %s2502_s21, %s2999_s12 }
  0xb6   : > { %p1794_p5 = scmp.lt.s32.totalorder %s1792_s7, %s1787_s5 }
  0xb7   : > { %p1790_p7 = pnand %p1789_p1, %p1788_p11 }
  0xb8   : > { %p1795_p8 = por %p1794_p5, %p1793_p3 }
  0xb9   : > { %p1791_p6 = pneg %p1790_p7 }
  0xbb   : > { %p1796_p4 = pnand %p1795_p8, %p1791_p6 }
  0xbd   : > { %1799 = shalt.err (!%p1796_p4)
}
  0xbe   : > { %s1800_s29 = scalar_lea.vmem %s2470_s11, 256  ;;  %s2078_s10 = smov [#allocation11]  }
  0xbf   : > { %p1801_p10 = scmp.ne.s32.totalorder %s2470_s11, %s1800_s29  ;;  %s1805_s17 = sshll.u32 %s2078_s10, 4  ;;  %s1806_s17 = int_to_ptr.vmem [resolvable:$false] %s1805_s17 }
  0xc0   : > { %s1807_s3 = scalar_lea.vmem %s1806_s17, 512  ;;  %p1808_p7 = scmp.lt.s32.totalorder %s2470_s11, %s1806_s17 }
  0xc1   : > { %p1803_p9 = pnand %p1801_p10, %p1789_p1  ;;  %p1809_p2 = scmp.lt.s32.totalorder %s1807_s3, %s1800_s29 }
  0xc3   : > { %p1804_p11 = pneg %p1803_p9  ;;  %p1810_p13 = por %p1809_p2, %p1808_p7 }
  0xc5   : > { %p1811_p12 = pnand %p1810_p13, %p1804_p11 }
  0xc7   : > { %1814 = shalt.err (!%p1811_p12)
}
  0xc8   : > { %1482 = dma.hbm_to_vmem [thread:$0]  (!%p2483_p0), %s2502_s21, 256, %s2470_s11, %s2319_s4, %s2984_s22, %s2984_s22, %s2983_s8  }
  0xc9   : > { %p3002_p13 = scmp.eq.s32.totalorder %s2250_s27, 0  ;;  %p3003_p2 = scmp.ne.s32.totalorder %s2017_s13, %s2013_s30 }
  0xca   : > { %s3005_s17 = sand.u32 1, %s2021_s14   ;;  %s3006_s5 = sld [smem:[#allocation36_spill]] }
  0xcb   : > { %p2537_p9 = por %p3003_p2, %p3002_p13  ;;  %s1333_s10 = sshll.u32 %s3005_s17, 4 }
  0xcc   : > { %s255_s24 = ssub.s32 %s2488_s1, %s2491_s23  ;;  %s3007_s7 = sld [smem:[#allocation35_spill]] }
  0xcd   : > { %s3004_s2 = scalar_select %p2537_p9, 1, 0 }
  0xce   : > { %p256_p12 = scmp.eq.s32.totalorder %s255_s24, 0  ;;  %s487_s20 = scalar_lea.vmem [#allocation14], %s1333_s10 }
  0xcf   : > { %s495_s9 = sshll.u32 %s487_s20, 4  ;;  %p3008_p1 = scmp.ne.s32.totalorder %s3001_s18, 0  ;;  %s2559_s9 = int_to_ptr.vmem [resolvable:$true] %s495_s9 }
  0xd0   : > { %s3009_s29 = sld [smem:[#allocation34_spill]]  ;;  %s3010_s30 = sadd.s32 1, %s2021_s14 }
  0xd1   : > { %s1455_s4 = scalar_select %p3008_p1, [#allocation4], [#allocation21] }
  0xd2   : > { %s2550_s11 = scalar_select %p256_p12, %s2021_s14, %s3010_s30  }
  0xd3   : > { %s1456_s21 = scalar_select %p3008_p1, %s2065_s25, 0 }
  0xd4   : > { %3011 = sst [smem:[#allocation51_spill]] %s2550_s11  ;;  %p3012_p0 = scmp.lt.s32.totalorder %s2069_s26, 2 }
  0xd5   : > { %s309_s17 = ssub.s32 %s2065_s25, %s3091_s28  ;;  %s312_s24 = sadd.s32 1, %s3006_s5 }
  0xd6   : > { %s3105_s4 = smov (!%p3012_p0, %s1455_s4), [#allocation25]  ;;  %p3013_p6 = pmov %p3012_p0 }
  0xd7   : > { %p3014_p3 = pmov %p3012_p0  ;;  %p2572_p8 = scmp.eq.s32.totalorder %s309_s17, 0 }
  0xd8   : > { %s3107_s21 = smov (!%p3013_p6, %s1456_s21), 0  ;;  %s3017_s11 = sld [smem:[#allocation59_spill]] }
  0xd9   : > { %p2565_p5 = pnand %p3014_p3, %p3008_p1  ;;  %s488_s23 = sld [smem:[%s3105_s4 + %s3107_s21]] }
  0xda   : > { %s3016_s10 = scalar_select %p2572_p8, 1, 0 }
  0xdb   : > { %p1817_p7 = pneg %p2565_p5 }
  0xdf   : > { %s1379_s20 = sshll.u32 %s488_s23, 8  ;;  %s1820_s23 = scalar_lea.hbm %s3017_s11, 512 }
  0xe0   : > { %s2582_s18 = scalar_lea.hbm %s3017_s11, %s1379_s20 }
  0xe1   : > { %s1815_s14 = scalar_lea.hbm %s2582_s18, 256  ;;  %p1821_p12 = scmp.lt.s32.totalorder %s2582_s18, %s3017_s11 }
  0xe2   : > { %p1816_p11 = scmp.ne.s32.totalorder %s2582_s18, %s1815_s14  ;;  %p1822_p1 = scmp.lt.s32.totalorder %s1820_s23, %s1815_s14 }
  0xe4   : > { %p1818_p13 = pnand %p1817_p7, %p1816_p11  ;;  %p1823_p0 = por %p1822_p1, %p1821_p12 }
  0xe6   : > { %p1819_p2 = pneg %p1818_p13 }
  0xe8   : > { %p1824_p6 = pnand %p1823_p0, %p1819_p2 }
  0xea   : > { %1827 = shalt.err (!%p1824_p6)
}
  0xeb   : > { %s1828_s12 = scalar_lea.vmem %s2559_s9, 256  ;;  %s2079_s20 = smov [#allocation14]  }
  0xec   : > { %p1829_p3 = scmp.ne.s32.totalorder %s2559_s9, %s1828_s12  ;;  %s1833_s30 = sshll.u32 %s2079_s20, 4  ;;  %s1834_s30 = int_to_ptr.vmem [resolvable:$false] %s1833_s30 }
  0xed   : > { %s1835_s4 = scalar_lea.vmem %s1834_s30, 512  ;;  %p1836_p13 = scmp.lt.s32.totalorder %s2559_s9, %s1834_s30 }
  0xee   : > { %p1831_p10 = pnand %p1829_p3, %p1817_p7  ;;  %p1837_p4 = scmp.lt.s32.totalorder %s1835_s4, %s1828_s12 }
  0xf0   : > { %p1832_p11 = pneg %p1831_p10  ;;  %p1838_p9 = por %p1837_p4, %p1836_p13 }
  0xf2   : > { %p1839_p8 = pnand %p1838_p9, %p1832_p11 }
  0xf4   : > { %1842 = shalt.err (!%p1839_p8)
}
  0xf5   : > { %1492 = dma.hbm_to_vmem [thread:$0]  (!%p2565_p5), %s2582_s18, 256, %s2559_s9, %s2405_s15, %s2984_s22, %s2984_s22, %s2983_s8  }
  0xf6   : > { %p3018_p9 = scmp.ne.s32.totalorder %s3016_s10, 0  ;;  %p3019_p8 = scmp.eq.s32.totalorder %s2069_s26, 0 }
  0xf7   : > { %p3020_p4 = scmp.ne.s32.totalorder %s3006_s5, %s3007_s7  ;;  %p3021_p7 = scmp.eq.s32.totalorder %s2250_s27, 0 }
  0xf8   : > { %s2613_s14 = scalar_select %p3018_p9, %s3006_s5, %s312_s24  }
  0xf9   : > { %p321_p10 = por %p3020_p4, %p3019_p8  ;;  %p3022_p2 = scmp.ne.s32.totalorder %s3007_s7, %s3009_s29 }
  0xfa   : > { %p351_p1 = scmp.eq.s32.totalorder %s2250_s27, 1  ;;  %s3024_s3 = sadd.s32 4294967294, %s2069_s26  }
  0xfb   : > { %p2625_p12 = por %p3022_p2, %p3021_p7  ;;  %p357_p0 = scmp.eq.s32.totalorder %s3024_s3, 1 }
  0xfc   : > { %s513_s21 = sand.u32 1, %s3006_s5   ;;  %s1337_s23 = sshll.u32 %s2065_s25, 6 }
  0xfd   : > { %p3025_p6 = pmov %p3020_p4  ;;  %p3027_p3 = pmov %p3022_p2 }
  0xfe   : > { %s1336_s10 = sshll.u32 %s513_s21, 4  ;;  %s3029_s17 = sld [smem:[#allocation61_spill]] }
  0xff   : > { %p2637_p5 = por %p351_p1, %p3025_p6  ;;  %p2644_p11 = por %p357_p0, %p3027_p3 }
 0x100   : > { %s517_s20 = scalar_lea.vmem [#allocation15], %s1336_s10  ;;  %p3030_p13 = scmp.lt.s32.totalorder %s2069_s26, 2 }
 0x101   : > { %s523_s30 = sshll.u32 %s517_s20, 4  ;;  %s514_s5 = scalar_lea.sflag [#allocation16], %s513_s21  ;;  %s524_s30 = int_to_ptr.vmem [resolvable:$true] %s523_s30 }
 0x102   : > { %p2653_p9 = pnand %p3030_p13, %p321_p10  ;;  %s1856_s7 = scalar_lea.vmem %s524_s30, 256 }
 0x103   : > { %p1857_p4 = scmp.ne.s32.totalorder %s524_s30, %s1856_s7  ;;  %s2080_s29 = smov [#allocation15]  }
 0x104   : > { %s522_s12 = scalar_lea.hbm %s3029_s17, %s1337_s23  ;;  %p1845_p8 = pneg %p2653_p9 }
 0x105   : > { %s1861_s3 = sshll.u32 %s2080_s29, 4  ;;  %s1862_s3 = int_to_ptr.vmem [resolvable:$false] %s1861_s3 }
 0x106   : > { %p1859_p7 = pnand %p1857_p4, %p1845_p8  ;;  %s1863_s23 = scalar_lea.vmem %s1862_s3, 512 }
 0x107   : > { %p1864_p1 = scmp.lt.s32.totalorder %s524_s30, %s1862_s3  ;;  %p1865_p0 = scmp.lt.s32.totalorder %s1863_s23, %s1856_s7 }
 0x108   : > { %p1860_p2 = pneg %p1859_p7 }
 0x109   : > { %p1866_p6 = por %p1865_p0, %p1864_p1 }
 0x10b   : > { %p1867_p10 = pnand %p1866_p6, %p1860_p2 }
 0x10d   : > { %1870 = shalt.err (!%p1867_p10)
}
 0x10e   : > { %s2081_s10 = smov 128   ;;  %p3032_p3 = scmp.ne.s32.totalorder %s2980_s0, 0 }
 0x10f   : > { %1495 = dma.hbm_to_vmem [thread:$0]  (!%p2653_p9), %s522_s12, 256, %s524_s30, %s514_s5, %s2081_s10, %s2984_s22, %s2983_s8  }
 0x110   : > { %535 = sbr.rel (%p3032_p3) target bundleno = 1435 (0x59b), region = 60  ;;  %p3033_p13 = scmp.eq.s32.totalorder (!%p3032_p3), %s2250_s27, 0 }
 0x115   : > { %1972 = dma.done.wait (%p3033_p13), [#allocation7], 128   ;;  %p3034_p8 = pmov %p3033_p13 }
 0x116   : > { %s3035_s21 = sld [smem:[#allocation41_spill]]  ;;  %s541_s18 = sand.u32 1, %s2250_s27  }
 0x117   : > { %1974 = vsyncadd (%p3034_p8), [#allocation7], 4294967168  ;;  %s3036_s24 = sld [smem:[#allocation46_spill]]  ;;  %s542_s4 = scalar_lea.sflag [#allocation10], %s541_s18 }
 0x11c   : > { %s543_s17 = sand.u32 1, %s3035_s21  }
 0x11d   : > { %s2671_s20 = sshll.u32 %s543_s17, 4  ;;  %p3037_p9 = scmp.ne.s32.totalorder %s3036_s24, 0 }
 0x11f   : > { %1976 = dma.done.wait (%p3037_p9), %s542_s4, 256  }
 0x120   : > { %1978 = vsyncadd (%p3037_p9), %s542_s4, 4294967040  ;;  %s552_s0 = sand.u32 1, %s2041_s19   ;;  %p3038_p4 = scmp.ne.s32.totalorder %s2992_s6, 0 }
 0x121   : > { %s2679_s8 = sshll.u32 %s552_s0, 4 }
 0x122   : > { %1980 = dma.done.wait (%p3038_p4), %s542_s4, 256  }
 0x123   : > { %1982 = vsyncadd (%p3038_p4), %s542_s4, 4294967040  ;;  %s3039_s27 = sld [smem:[#allocation48_spill]]  ;;  %s561_s12 = sand.u32 1, %s2029_s16  }
 0x124   : > { %s2687_s30 = sshll.u32 %s561_s12, 4  ;;  %s560_s5 = scalar_lea.sflag [#allocation13], %s541_s18 }
 0x129   : > { %p3040_p7 = scmp.ne.s32.totalorder %s3039_s27, 0 }
 0x12b   : > { %1984 = dma.done.wait (%p3040_p7), %s560_s5, 256  }
 0x12c   : > { %1986 = vsyncadd (%p3040_p7), %s560_s5, 4294967040  ;;  %s570_s3 = sand.u32 1, %s2017_s13   ;;  %p3041_p2 = scmp.ne.s32.totalorder %s3004_s2, 0 }
 0x12d   : > { %s2695_s23 = sshll.u32 %s570_s3, 4 }
 0x12e   : > { %1988 = dma.done.wait (%p3041_p2), %s560_s5, 256  }
 0x12f   : > { %1990 = vsyncadd (%p3041_p2), %s560_s5, 4294967040  ;;  %s3042_s10 = sld [smem:[#allocation35_spill]] }
 0x135   : > { %s2703_s21 = sand.u32 1, %s3042_s10  }
 0x136   : > { %s1344_s24 = sshll.u32 %s2703_s21, 4  ;;  %s578_s18 = scalar_lea.sflag [#allocation16], %s2703_s21 }
 0x137   : > { %s2707_s17 = scalar_lea.vmem [#allocation15], %s1344_s24 }
 0x138   : > { %1992 = dma.done.wait (%p2625_p12), %s578_s18, 256  }
 0x139   : > { %1994 = vsyncadd (%p2625_p12), %s578_s18, 4294967040  ;;  %s3043_s4 = sld [smem:[#allocation43_spill]]  ;;  %s1345_s2 = sshll.u32 %s2703_s21, 3 }
 0x13a   : > { %s3045_s22 = sld [smem:[#allocation56_spill]]  ;;  %s2743_s18 = scalar_lea.vmem [#allocation17], %s1345_s2 }
 0x13b   : > { %s3046_s28 = sld [smem:[#allocation58_spill]] }
 0x13c   : > { %s3047_s10 = sld [smem:[#allocation60_spill]] }
 0x13f   : > { %s656_s0 = sld [smem:[#allocation4 + %s3043_s4]] }
 0x140   : > { %s662_s27 = sld [smem:[#allocation4 + %s3043_s4]] }
 0x141   : > { %s668_s12 = sld [smem:[#allocation4 + %s3043_s4]] }
 0x142   : > { %s674_s5 = sld [smem:[#allocation4 + %s3043_s4]] }
 0x143   : > { %s681_s3 = sld [smem:[#allocation5 + %s3043_s4]] }
 0x145   : > { %p657_p1 = scmp.lt.s32.totalorder %s656_s0, 1 }
 0x146   : > { %p663_p0 = scmp.lt.s32.totalorder %s662_s27, 1 }
 0x147   : > { %s3109_s0 = smov (!%p657_p1, %s656_s0), 1  ;;  %p669_p12 = scmp.lt.s32.totalorder %s668_s12, 1 }
 0x148   : > { %s3111_s27 = smov (!%p663_p0, %s662_s27), 1  ;;  %p675_p6 = scmp.lt.s32.totalorder %s674_s5, 1 }
 0x149   : > { %s665_s7 = scalar_lea.vmem %s3045_s22, %s3111_s27  ;;  %s3113_s12 = smov (!%p669_p12, %s668_s12), 1 }
 0x14a   : > { %s3115_s5 = smov (!%p675_p6, %s674_s5), 1  ;;  %s671_s25 = scalar_lea.vmem %s3046_s28, %s3113_s12 }
 0x14b   : > { %s677_s24 = scalar_lea.vmem %s3047_s10, %s3115_s5  ;;  %p1346_p10 = scmp.ne.s32.totalorder %s681_s3, 1 }
 0x14c   : > { %s3048_s22 = scalar_lea.vmem (!%p1346_p10), [#allocation9], %s2671_s20  ;;  %s3050_s19 = scalar_lea.vmem (!%p1346_p10), [#allocation11], %s2679_s8 }
 0x14d   : > { %685 = sbr.rel (%p1346_p10) target bundleno = 1212 (0x4bc), region = 88  ;;  %s3049_s11 = smov (!%p1346_p10), %s3048_s22 }
 0x14e   : > { %s3051_s28 = smov (!%p1346_p10), %s3050_s19  ;;  %s3052_s6 = sld [smem:[#allocation54_spill]] (!%p1346_p10) }
 0x14f   : > { %s3054_s8 = scalar_lea.vmem (!%p1346_p10), [#allocation12], %s2687_s30 }
 0x150   : > { %s3055_s3 = smov (!%p1346_p10), %s3054_s8 }
 0x152   : > { %v1661_v0 = vld [vmem:[%s3048_s22 + $0x8] sm:$0xff]   ;;  %v2082_v1 = vmov 0.0   ;;  %v1662_v2 = vld [vmem:[%s3049_s11] sm:$0xff]   ;;  %vm2083_vm0 = vmmov 0   ;;  %vm716_vm1 = vcmask 261120   ;;  %vm1003_vm2 = vcmask 257024  }
 0x153   : > { %1404 = vmatprep.subr.bf16.mxu0 %v2082_v1  ;;  %1412 = vmatprep.subr.bf16.mxu1 %v2082_v1  ;;  %v1663_v3 = vld [vmem:[#allocation6] sm:$0xff]   ;;  %v1665_v5 = vld [vmem:[%s3051_s28] sm:$0xff]  }
 0x154   : > { %1405 = vmatpush3.bf16.msra.mxu0 %v1661_v0  ;;  %1408 = vmatprep.mubr.msk.bf16.mxu0 %vm2083_vm0, %v2082_v1  ;;  %v1664_v4 = vld [vmem:[%s3050_s19 + $0x8] sm:$0xff]   ;;  %s3053_s2 = scalar_lea.vmem %s3052_s6, %s3109_s0  ;;  %v1667_v15 = vld [vmem:[%s3055_s3] sm:$0xff]  }
 0x155   : > { %1406 = vmatprep.subr.bf16.mxu0 %v2082_v1  ;;  %1416 = vmatprep.mubr.msk.bf16.mxu1 %vm2083_vm0, %v2082_v1  ;;  %v1347_v7 = vld [vmem:[%s3053_s2] ss:$0 sm:$0xff]  ;;  %v1666_v14 = vld [vmem:[%s3054_s8 + $0x8] sm:$0xff]  }
 0x156   : > { %1413 = vmatpush3.bf16.msra.mxu1 %v1664_v4  ;;  %v1352_v16 = vld [vmem:[%s665_s7] ss:$0 sm:$0xff]  ;;  %s3057_s7 = scalar_lea.vmem [#allocation14], %s2695_s23 }
 0x157   : > { %1414 = vmatprep.subr.bf16.mxu1 %v2082_v1  ;;  %v1668_v34 = vld [vmem:[%s3057_s7 + $0x8] sm:$0xff]   ;;  %s3058_s30 = smov %s3057_s7  ;;  %v1356_v36 = vld [vmem:[%s671_s25] ss:$0 sm:$0xff] }
 0x158   : > { %1407 = vmatpush3.bf16.msra.mxu0 %v1662_v2  ;;  %v1669_v35 = vld [vmem:[%s3058_s30] sm:$0xff]  }
 0x159   : > { %1420 = vmatprep.subr.bf16.mxu0 %v2082_v1  ;;  %v1360_v54 = vld [vmem:[%s677_s24] ss:$0 sm:$0xff] }
 0x15a   : > { %1415 = vmatpush3.bf16.msra.mxu1 %v1665_v5 }
 0x15b   : > { %1409 = vmatmul.mubr.msk.bf16.vlgmr.msra.gmra.mxu0 %vm716_vm1, %v1663_v3  ;;  %1428 = vmatprep.subr.bf16.mxu1 %v2082_v1 }
 0x15c   : > { %1424 = vmatprep.mubr.msk.bf16.mxu0 %vm2083_vm0, %v2082_v1  ;;  %1421 = vmatpush3.bf16.msra.mxu0 %v1666_v14 }
 0x15d   : > { %1422 = vmatprep.subr.bf16.mxu0 %v2082_v1 }
 0x160   : > { %1423 = vmatpush3.bf16.msra.mxu0 %v1667_v15 }
 0x21b   : > { %v754_v6 = vpop.f32.mrf.mxu0 }
 0x21c   : > { %v755_v10 = vadd.f32 %v1347_v7, %v754_v6 }
 0x21d   : > { %v1410_v8 = vpop.f32.mrf.mxu0 }
 0x21f   : > { %v757_v9 = vpop.f32.mrf.mxu0 }
 0x220   : > { %v758_v11 = vadd.f32 %v1347_v7, %v757_v9 }
 0x221   : > { %v1411_v12 = vpop.f32.mrf.mxu0 }
 0x222   : > { %v761_v13 = vpack.c.bf16 %v758_v11, %v755_v10 }
 0x224   : > { %1417 = vmatmul.mubr.msk.bf16.vlgmr.msra.gmra.mxu1 %vm716_vm1, %v761_v13 }
 0x225   : > { %1432 = vmatprep.mubr.msk.bf16.mxu1 %vm2083_vm0, %v2082_v1  ;;  %1429 = vmatpush3.bf16.msra.mxu1 %v1668_v34 }
 0x226   : > { %1430 = vmatprep.subr.bf16.mxu1 %v2082_v1 }
 0x229   : > { %1431 = vmatpush3.bf16.msra.mxu1 %v1669_v35 }
 0x2e4   : > { %v822_v17 = vpop.f32.mrf.mxu1 }
 0x2e5   : > { %v823_v18 = vadd.f32 %v1352_v16, %v822_v17 }
 0x2e6   : > { %v1418_v19 = vpop.f32.mrf.mxu1 }
 0x2e7   : > { %v831_v20 = vmul.f32 0.70710677, %v823_v18  ;;  %v829_v28 = vmul.f32 0.5, %v823_v18 }
 0x2e8   : > { %v825_v21 = vpop.f32.mrf.mxu1 }
 0x2e9   : > { %1670 = verf.f32 %v831_v20  ;;  %v826_v22 = vadd.f32 %v1352_v16, %v825_v21 }
 0x2ea   : > { %v1419_v23 = vpop.f32.mrf.mxu1 }
 0x2eb   : > { %v832_v24 = vmul.f32 0.70710677, %v826_v22  ;;  %v830_v29 = vmul.f32 0.5, %v826_v22 }
 0x2ed   : > { %1672 = verf.f32 %v832_v24 }
 0x2f6   : > { %v1671_v25 = vpop.eup %1670 }
 0x2f7   : > { %v835_v26 = vadd.f32 1.0, %v1671_v25 }
 0x2f9   : > { %v837_v31 = vmul.f32 %v835_v26, %v829_v28 }
 0x2fa   : > { %v1673_v27 = vpop.eup %1672 }
 0x2fb   : > { %v836_v30 = vadd.f32 1.0, %v1673_v27 }
 0x2fd   : > { %v838_v32 = vmul.f32 %v836_v30, %v830_v29 }
 0x2ff   : > { %v839_v33 = vpack.c.bf16 %v838_v32, %v837_v31 }
 0x301   : > { %1425 = vmatmul.mubr.msk.bf16.vlgmr.msra.gmra.mxu0 %vm716_vm1, %v839_v33 }
 0x3c1   : > { %v900_v37 = vpop.f32.mrf.mxu0 }
 0x3c2   : > { %v901_v38 = vadd.f32 %v1356_v36, %v900_v37 }
 0x3c3   : > { %v1426_v39 = vpop.f32.mrf.mxu0 }
 0x3c4   : > { %v909_v40 = vmul.f32 0.70710677, %v901_v38  ;;  %v907_v48 = vmul.f32 0.5, %v901_v38 }
 0x3c5   : > { %v903_v41 = vpop.f32.mrf.mxu0 }
 0x3c6   : > { %1674 = verf.f32 %v909_v40  ;;  %v904_v42 = vadd.f32 %v1356_v36, %v903_v41 }
 0x3c7   : > { %v1427_v43 = vpop.f32.mrf.mxu0 }
 0x3c8   : > { %v910_v44 = vmul.f32 0.70710677, %v904_v42  ;;  %v908_v49 = vmul.f32 0.5, %v904_v42 }
 0x3ca   : > { %1676 = verf.f32 %v910_v44 }
 0x3d3   : > { %v1675_v45 = vpop.eup %1674 }
 0x3d4   : > { %v913_v46 = vadd.f32 1.0, %v1675_v45 }
 0x3d6   : > { %v915_v51 = vmul.f32 %v913_v46, %v907_v48 }
 0x3d7   : > { %v1677_v47 = vpop.eup %1676 }
 0x3d8   : > { %v914_v50 = vadd.f32 1.0, %v1677_v47 }
 0x3da   : > { %v916_v52 = vmul.f32 %v914_v50, %v908_v49 }
 0x3dc   : > { %v917_v53 = vpack.c.bf16 %v916_v52, %v915_v51 }
 0x3de   : > { %1433 = vmatmul.mubr.msk.bf16.vlgmr.msra.gmra.mxu1 %vm716_vm1, %v917_v53 }
 0x49e   : > { %v978_v55 = vpop.f32.mrf.mxu1 }
 0x49f   : > { %v979_v56 = vadd.f32 %v1360_v54, %v978_v55 }
 0x4a0   : > { %v1434_v57 = vpop.f32.mrf.mxu1 }
 0x4a1   : > { %v987_v58 = vmul.f32 0.70710677, %v979_v56  ;;  %v985_v0 = vmul.f32 0.5, %v979_v56 }
 0x4a2   : > { %v981_v59 = vpop.f32.mrf.mxu1 }
 0x4a3   : > { %1678 = verf.f32 %v987_v58  ;;  %v982_v60 = vadd.f32 %v1360_v54, %v981_v59 }
 0x4a4   : > { %v1435_v61 = vpop.f32.mrf.mxu1 }
 0x4a5   : > { %v988_v62 = vmul.f32 0.70710677, %v982_v60  ;;  %v986_v5 = vmul.f32 0.5, %v982_v60 }
 0x4a7   : > { %1680 = verf.f32 %v988_v62 }
 0x4b0   : > { %v1679_v63 = vpop.eup %1678 }
 0x4b1   : > { %v991_v1 = vadd.f32 1.0, %v1679_v63 }
 0x4b3   : > { %v993_v2 = vmul.f32 %v991_v1, %v985_v0 }
 0x4b4   : > { %v1681_v3 = vpop.eup %1680 }
 0x4b5   : > { %v1380_v4 = vpack.c.bf16 %v993_v2, %v993_v2  ;;  %v992_v6 = vadd.f32 1.0, %v1681_v3 }
 0x4b7   : > { %1004 = vst.msk [vmem:[#allocation2] sm:$0xf] %vm1003_vm2, %v1380_v4  ;;  %v994_v7 = vmul.f32 %v992_v6, %v986_v5 }
 0x4b9   : > { %v1381_v8 = vpack.c.bf16 %v994_v7, %v994_v7 }
 0x4bb   : > { %1005 = vst.msk [vmem:[#allocation2 + $0x4] sm:$0xf] %vm1003_vm2, %v1381_v8 }
 0x4bc PF: > { %s3061_s5 = sld [smem:[#allocation43_spill]]  ;;  %v1682_v9 = vld [vmem:[%s2707_s17 + $0x8] sm:$0xff]   ;;  %v2084_v10 = vmov 0.0   ;;  %v1683_v11 = vld [vmem:[%s2707_s17] sm:$0xff]   ;;  %vm2085_vm3 = vmmov 0   ;;  %vm1029_vm4 = vcmask 261120  }
 0x4bd   : > { %1436 = vmatprep.subr.bf16.mxu0 %v2084_v10  ;;  %1440 = vmatprep.mubr.msk.bf16.mxu0 %vm2085_vm3, %v2084_v10  ;;  %s1100_s11 = sshll.u32 %s2743_s18, 4  ;;  %s3062_s20 = sld [smem:[#allocation62_spill]]  ;;  %s2798_s11 = int_to_ptr.vmem [resolvable:$true] %s1100_s11 }
 0x4be   : > { %1437 = vmatpush3.bf16.msra.mxu0 %v1682_v9  ;;  %s1085_s17 = scalar_lea.sflag [#allocation8], %s2703_s21  ;;  %s1871_s2 = scalar_lea.vmem %s2798_s11, 128 }
 0x4bf   : > { %1438 = vmatprep.subr.bf16.mxu0 %v2084_v10  ;;  %p1872_p3 = scmp.ne.s32.totalorder %s2798_s11, %s1871_s2  ;;  %s2086_s8 = smov [#allocation17]  }
 0x4c0   : > { %s1875_s3 = sshll.u32 %s2086_s8, 4  ;;  %s1876_s3 = int_to_ptr.vmem [resolvable:$false] %s1875_s3 }
 0x4c1   : > { %p1873_p13 = pnand %p1872_p3, %p2637_p5  ;;  %s1877_s4 = scalar_lea.vmem %s1876_s3, 256 }
 0x4c2   : > { %v1684_v12 = vld [vmem:[#allocation2] sm:$0xff]   ;;  %1439 = vmatpush3.bf16.msra.mxu0 %v1683_v11  ;;  %s1373_s24 = sshll.u32 %s3061_s5, 6  ;;  %p1878_p9 = scmp.lt.s32.totalorder %s2798_s11, %s1876_s3 }
 0x4c3   : > { %s3063_s6 = smov %s3062_s20  ;;  %s2796_s29 = scalar_lea.hbm %s3062_s20, %s1373_s24 }
 0x4c4   : > { %p1874_p8 = pneg %p1873_p13  ;;  %p1879_p4 = scmp.lt.s32.totalorder %s1877_s4, %s1871_s2 }
 0x4c5   : > { %1441 = vmatmul.mubr.msk.bf16.vlgmr.msra.gmra.mxu0 %vm1029_vm4, %v1684_v12 }
 0x4c6   : > { %p1880_p7 = por %p1879_p4, %p1878_p9 }
 0x4c8   : > { %p1881_p2 = pnand %p1880_p7, %p1874_p8 }
 0x585   : > { %v1067_v13 = vpop.f32.mrf.mxu0 }
 0x587   : > { %v1442_v14 = vpop.f32.mrf.mxu0 }
 0x589   : > { %v1070_v15 = vpop.f32.mrf.mxu0 }
 0x58a   : > { %v1387_v16 = vpack.c.bf16 %v1070_v15, %v1067_v13 }
 0x58b   : > { %v1443_v17 = vpop.f32.mrf.mxu0 }
 0x58c   : > { %1388 = vst [vmem:[%s2743_s18] sm:$0xff] %v1387_v16  }
 0x58d   : > { %1884 = shalt.err (!%p1881_p2)
}
 0x58e   : > { %s1885_s18 = scalar_lea.hbm %s2796_s29, 128  ;;  %s1889_s7 = scalar_lea.hbm %s3063_s6, 256 }
 0x58f   : > { %p1886_p1 = scmp.ne.s32.totalorder %s2796_s29, %s1885_s18  ;;  %p1890_p6 = scmp.lt.s32.totalorder %s2796_s29, %s3063_s6 }
 0x590   : > { %p1891_p10 = scmp.lt.s32.totalorder %s1889_s7, %s1885_s18 }
 0x591   : > { %p1887_p0 = pnand %p1886_p1, %p2637_p5 }
 0x592   : > { %p1892_p3 = por %p1891_p10, %p1890_p6 }
 0x593   : > { %p1888_p12 = pneg %p1887_p0 }
 0x595   : > { %p1893_p13 = pnand %p1892_p3, %p1888_p12 }
 0x597   : > { %1896 = shalt.err (!%p1893_p13)
}
 0x598   : > { %s2087_s10 = smov 64   ;;  %s2088_s22 = smov 128  }
 0x599   : > { %s2089_s25 = smov 4  }
 0x59a   : > { %1466 = dma.vmem_to_hbm [thread:$0]  (%p2637_p5), %s2798_s11, 128, %s2796_s29, %s1085_s17, %s2087_s10, %s2088_s22, %s2089_s25  }
 0x59b PF: > { %s3064_s23 = sld [smem:[#allocation34_spill]]  ;;  %p3065_p8 = scmp.ge.s32.totalorder %s2069_s26, 2 }
 0x59d   : > { %p1497_p9 = pnand %p3065_p8, %p2644_p11 }
 0x59f   : > { %p1498_p4 = pneg %p1497_p9 }
 0x5a1   : > { %s1115_s12 = sand.u32 1, %s3064_s23  }
 0x5a2   : > { %s1116_s5 = scalar_lea.sflag [#allocation8], %s1115_s12 }
 0x5a3   : > { %1996 = dma.done.wait (%p1498_p4), %s1116_s5, 128  }
 0x5a4   : > { %1998 = vsyncadd (%p1498_p4), %s1116_s5, 4294967168  ;;  %s43_s26 = sadd.s32 1, %s2069_s26   ;;  %s3067_s0 = sld [smem:[#allocation35_spill]] }
 0x5a5   : > { %p2830_p7 = scmp.ge.s32.totalorder %s43_s26, 4   ;;  %s3068_s1 = sld [smem:[#allocation36_spill]] }
 0x5a6   : > { %s3069_s15 = sld [smem:[#allocation37_spill]]  ;;  %s3081_s29 = smov %s2613_s14 }
 0x5a7   : > { %s3070_s21 = sld [smem:[#allocation51_spill]]  ;;  %s3083_s30 = smov %s2017_s13 }
 0x5a8   : > { %s3071_s9 = sld [smem:[#allocation38_spill]] }
 0x5a9   : > { %s3072_s17 = sld [smem:[#allocation49_spill]] }
 0x5aa   : > { %s3073_s18 = sld [smem:[#allocation39_spill]] }
 0x5ab   : > { %s3074_s19 = sld [smem:[#allocation40_spill]] }
 0x5ac   : > { %s3075_s20 = sld [smem:[#allocation50_spill]]  ;;  %s3084_s13 = smov %s3069_s15 }
 0x5ad   : > { %s3076_s11 = sld [smem:[#allocation41_spill]]  ;;  %s3085_s14 = smov %s3070_s21 }
 0x5ae   : > { %s3077_s22 = sld [smem:[#allocation42_spill]]  ;;  %s3086_s15 = smov %s2029_s16 }
 0x5af   : > { %s3078_s23 = sld [smem:[#allocation47_spill]]  ;;  %s3087_s16 = smov %s3071_s9 }
 0x5b0   : > { %s3079_s28 = sld [smem:[#allocation44_spill]] }
 0x5b1   : > { %s3080_s25 = sld [smem:[#allocation45_spill]] }
 0x5b2   :  { %42 = sbr.rel (!%p2830_p7) target bundleno = 36 (0x24), region = 175 }
 0x5b3   : > { %s3088_s21 = smov %s3076_s11 }
 0x5b6   : > { %s3089_s24 = smov %s3079_s28 }
 0x5b7   :  { %1121 = vsyncpa [#allocation7], 1 }
 0x5b8   :  { %1123 = vsyncpa [#allocation7 + $0x1], 1 }
 0x5b9   :  { %1124 = vsyncpa [#allocation10], 1 }
 0x5ba   :  { %1126 = vsyncpa [#allocation10 + $0x1], 1 }
 0x5bb   :  { %1127 = vsyncpa [#allocation13], 1 }
 0x5bc   :  { %1129 = vsyncpa [#allocation13 + $0x1], 1 }
 0x5bd   :  { %1130 = vsyncpa [#allocation16], 1 }
 0x5be   :  { %1132 = vsyncpa [#allocation16 + $0x1], 1 }
 0x5bf   :  { %1133 = vsyncpa [#allocation8], 1 }
 0x5c0   :  { %1135 = vsyncpa [#allocation8 + $0x1], 1 }

</bundles_post_ra>
